<compile_context>
chip_gen: v6e
topology: v6e:2x2x1
jax: 0.10.0
libtpu: 0.0.40
codegen_flags: <defaults>
</compile_context>

<pallas_src>
import functools
import math

import jax
import jax.numpy as jnp
import numpy as np
from jax.experimental import pallas as pl
from jax.experimental.pallas import tpu as pltpu

EPS = 1e-5  # norm_eps default


def _default_vmem_limit():
    try:
        cap = pltpu.get_tpu_info().vmem_capacity_bytes
        if cap >= 96 * 1024 * 1024:          # v5e / v6e: 128 MiB physical VMEM
            return 100 * 1024 * 1024
        return 48 * 1024 * 1024              # v7x: 64 MiB physical per TensorCore
    except Exception:
        return 48 * 1024 * 1024


VMEM_LIMIT = _default_vmem_limit()


# ----------------------------------------------------------------------------- helpers
def _ln(x, g, b, eps):
    mu = jnp.mean(x, axis=-1, keepdims=True)
    var = jnp.mean((x - mu) ** 2, axis=-1, keepdims=True)
    return (x - mu) * jax.lax.rsqrt(var + eps) * g + b


def _pick_seq_tile(n, target):
    """Largest multiple of 8 <= target that divides n (sublane constraint); else n."""
    if n <= target:
        return n
    t = (target // 8) * 8
    while t >= 8:
        if n % t == 0:
            return t
        t -= 8
    return n


def _pick_inner_tile(n, target):
    """Largest multiple of 128 <= target that divides n (lane constraint); else n."""
    if n <= target:
        return n
    t = (target // 128) * 128
    while t >= 128:
        if n % t == 0:
            return t
        t -= 128
    return n


# ----------------------------------------------------------------------------- kernels
def _proj_kernel(*refs, n_w, heads, head_dim, apply_ln, eps):
    """(optional LN) -> one deep-K matmul per projection -> per-head bf16 stores."""
    bf = jnp.bfloat16
    if apply_ln:
        x_ref, g_ref, b_ref = refs[0], refs[1], refs[2]
        w_refs = refs[3:3 + n_w]
        out_refs = refs[3 + n_w:]
    else:
        x_ref = refs[0]
        w_refs = refs[1:1 + n_w]
        out_refs = refs[1 + n_w:]

    x = x_ref[0]
    if apply_ln:
        nx = _ln(x.astype(jnp.float32), g_ref[0], b_ref[0], eps).astype(bf)
    else:
        nx = x.astype(bf)

    for w_ref, o_ref in zip(w_refs, out_refs):
        y = jnp.dot(nx, w_ref[...], preferred_element_type=jnp.float32)  # (TP, DI)
        for h in range(heads):                          # head split only at the store
            o_ref[0, h] = y[:, h * head_dim:(h + 1) * head_dim].astype(bf)


def _flash_attn_kernel(x_ref, q_ref, k_ref, v_ref, wo_ref, bo_ref, o_ref,
                       m_ref, l_ref, acc_ref, cat_ref, *, heads, head_dim):
    bf = jnp.bfloat16
    t = pl.program_id(2)                                # kv-tile reduction axis

    @pl.when(t == 0)
    def _init():
        m_ref[...] = jnp.full(m_ref.shape, -jnp.inf, jnp.float32)
        l_ref[...] = jnp.zeros(l_ref.shape, jnp.float32)
        acc_ref[...] = jnp.zeros(acc_ref.shape, jnp.float32)

    q = q_ref[0]                                        # (H, TS, hd) bf16, scale folded in
    k = k_ref[0]                                        # (H, TK, hd) bf16
    v = v_ref[0]
    # All-head scores with one batched dot_general (no per-head lane slicing).
    s = jnp.einsum("hqd,hkd->hqk", q, k, preferred_element_type=jnp.float32)

    m_prev = m_ref[...]
    m_new = jnp.maximum(m_prev, jnp.max(s, axis=-1, keepdims=True))
    alpha = jnp.exp(m_prev - m_new)
    p = jnp.exp(s - m_new)
    l_ref[...] = alpha * l_ref[...] + jnp.sum(p, axis=-1, keepdims=True)
    acc_ref[...] = alpha * acc_ref[...] + jnp.einsum(
        "hqk,hkd->hqd", p.astype(bf), v, preferred_element_type=jnp.float32)
    m_ref[...] = m_new

    @pl.when(t == pl.num_programs(2) - 1)
    def _finalize():
        inv_l = pl.reciprocal(l_ref[...], approx=False)     # EUP; exact per review
        o = acc_ref[...] * inv_l                            # (H, TS, hd) f32
        # Concatenate heads into a (TS, DI) scratch once, then ONE deep-K out-proj matmul.
        for h in range(heads):
            cat_ref[:, h * head_dim:(h + 1) * head_dim] = o[h].astype(bf)
        out = jnp.dot(cat_ref[...], wo_ref[...], preferred_element_type=jnp.float32)
        o_ref[0] = out + bo_ref[0] + x_ref[0]               # out-proj bias + residual


def _ln_ff_kernel(x_ref, g_ref, bta_ref, wval_ref, bval_ref, wgate_ref, bgate_ref,
                  w2_ref, b2_ref, *rest, eps, use_adapter):
    if use_adapter:
        aw1_ref, ab1_ref, aw2_ref, ab2_ref, o_ref, nx_ref, acc_ref = rest
    else:
        o_ref, nx_ref, acc_ref = rest
    bf = jnp.bfloat16
    k = pl.program_id(2)                                # GEGLU inner-dim reduction axis

    @pl.when(k == 0)
    def _init():
        x = x_ref[0]                                    # (TS, D) f32
        # LayerNorm computed ONCE per tile and cached (reused for every inner-dim step).
        nx_ref[...] = _ln(x, g_ref[0], bta_ref[0], eps).astype(bf)
        base = x + b2_ref[0]                            # residual + out-proj bias
        if use_adapter:                                 # Adapter(skip_connect=False) on raw x
            xb = x.astype(bf)
            ah = jax.nn.gelu(
                jnp.dot(xb, aw1_ref[...], preferred_element_type=jnp.float32) + ab1_ref[0],
                approximate=False)
            base = base + jnp.dot(ah.astype(bf), aw2_ref[...],
                                  preferred_element_type=jnp.float32) + ab2_ref[0]
        acc_ref[...] = base

    nx = nx_ref[...]                                    # cached bf16 LN output
    val = jnp.dot(nx, wval_ref[...], preferred_element_type=jnp.float32) + bval_ref[0]
    gate = jnp.dot(nx, wgate_ref[...], preferred_element_type=jnp.float32) + bgate_ref[0]
    y = (val * jax.nn.gelu(gate, approximate=False)).astype(bf)
    acc_ref[...] += jnp.dot(y, w2_ref[...], preferred_element_type=jnp.float32)

    @pl.when(k == pl.num_programs(2) - 1)
    def _done():
        o_ref[0] = acc_ref[...]


# ----------------------------------------------------------------------------- wrappers
def project_heads(x, weights, g=None, beta=None, *, heads, head_dim,
                  apply_ln=True, seq_tile=None):
    """Project x (optionally LayerNormed) with each weight; outputs (B, H, Sx, hd) bf16."""
    B, Sx, Din = x.shape
    TP = _pick_seq_tile(Sx, seq_tile or 512)
    n_w = len(weights)
    kernel = functools.partial(_proj_kernel, n_w=n_w, heads=heads, head_dim=head_dim,
                               apply_ln=apply_ln, eps=EPS)

    in_specs = [pl.BlockSpec((1, TP, Din), lambda b, s: (b, s, 0))]
    args = [x]
    if apply_ln:
        in_specs += [pl.BlockSpec((1, Din), lambda b, s: (0, 0)),
                     pl.BlockSpec((1, Din), lambda b, s: (0, 0))]
        args += [g, beta]
    for w in weights:
        in_specs.append(pl.BlockSpec((Din, w.shape[1]), lambda b, s: (0, 0)))
        args.append(w)

    out_shape = tuple(jax.ShapeDtypeStruct((B, heads, Sx, head_dim), jnp.bfloat16)
                      for _ in range(n_w))
    out_specs = tuple(pl.BlockSpec((1, heads, TP, head_dim), lambda b, s: (b, 0, s, 0))
                      for _ in range(n_w))

    return pl.pallas_call(
        kernel,
        out_shape=out_shape,
        grid=(B, Sx // TP),
        in_specs=in_specs,
        out_specs=out_specs,
        compiler_params=pltpu.CompilerParams(
            dimension_semantics=("parallel", "parallel"),
            vmem_limit_bytes=VMEM_LIMIT),
    )(*args)


def flash_attn_block(x, q, k, v, wo, bo, *, heads, head_dim,
                     seq_tile=None, kv_tile=None):
    """Flash attention over pre-projected per-head Q/K/V, + out-projection + residual."""
    B, S, D = x.shape
    Skv = k.shape[2]
    DI = heads * head_dim
    TS = _pick_seq_tile(S, seq_tile or 256)
    TK = _pick_seq_tile(Skv, kv_tile or 512)
    kernel = functools.partial(_flash_attn_kernel, heads=heads, head_dim=head_dim)

    return pl.pallas_call(
        kernel,
        out_shape=jax.ShapeDtypeStruct((B, S, D), jnp.float32),
        grid=(B, S // TS, Skv // TK),
        in_specs=[
            pl.BlockSpec((1, TS, D), lambda b, s, t: (b, s, 0)),          # residual tile
            pl.BlockSpec((1, heads, TS, head_dim), lambda b, s, t: (b, 0, s, 0)),
            pl.BlockSpec((1, heads, TK, head_dim), lambda b, s, t: (b, 0, t, 0)),
            pl.BlockSpec((1, heads, TK, head_dim), lambda b, s, t: (b, 0, t, 0)),
            pl.BlockSpec((DI, D), lambda b, s, t: (0, 0)),                # wo (constant)
            pl.BlockSpec((1, D), lambda b, s, t: (0, 0)),                 # bo (constant)
        ],
        out_specs=pl.BlockSpec((1, TS, D), lambda b, s, t: (b, s, 0)),
        scratch_shapes=[
            pltpu.VMEM((heads, TS, 1), jnp.float32),        # running max m
            pltpu.VMEM((heads, TS, 1), jnp.float32),        # running sum l
            pltpu.VMEM((heads, TS, head_dim), jnp.float32),  # acc
            pltpu.VMEM((TS, DI), jnp.bfloat16),             # head concat for out-proj
        ],
        compiler_params=pltpu.CompilerParams(
            dimension_semantics=("parallel", "parallel", "arbitrary"),
            vmem_limit_bytes=VMEM_LIMIT),
    )(x, q, k, v, wo, bo)


def ln_ff_block(x, norm, ff, adapter=None, *, seq_tile=None, inner_tile=None):
    B, S, D = x.shape
    inner = ff["w2"].shape[0]
    TS = _pick_seq_tile(S, seq_tile or 256)
    TI = _pick_inner_tile(inner, inner_tile or 512)
    use_adapter = adapter is not None
    kernel = functools.partial(_ln_ff_kernel, eps=EPS, use_adapter=use_adapter)

    in_specs = [
        pl.BlockSpec((1, TS, D), lambda b, s, k: (b, s, 0)),
        pl.BlockSpec((1, D), lambda b, s, k: (0, 0)),
        pl.BlockSpec((1, D), lambda b, s, k: (0, 0)),
        pl.BlockSpec((D, TI), lambda b, s, k: (0, k)),
        pl.BlockSpec((1, TI), lambda b, s, k: (0, k)),
        pl.BlockSpec((D, TI), lambda b, s, k: (0, k)),
        pl.BlockSpec((1, TI), lambda b, s, k: (0, k)),
        pl.BlockSpec((TI, D), lambda b, s, k: (k, 0)),
        pl.BlockSpec((1, D), lambda b, s, k: (0, 0)),
    ]
    args = [x, norm["g"], norm["b"], ff["w_val"], ff["b_val"], ff["w_gate"], ff["b_gate"],
            ff["w2"], ff["b2"]]
    if use_adapter:
        ahid = adapter["w1"].shape[1]
        in_specs += [
            pl.BlockSpec((D, ahid), lambda b, s, k: (0, 0)),
            pl.BlockSpec((1, ahid), lambda b, s, k: (0, 0)),
            pl.BlockSpec((ahid, D), lambda b, s, k: (0, 0)),
            pl.BlockSpec((1, D), lambda b, s, k: (0, 0)),
        ]
        args += [adapter["w1"], adapter["b1"], adapter["w2"], adapter["b2"]]

    return pl.pallas_call(
        kernel,
        out_shape=jax.ShapeDtypeStruct((B, S, D), jnp.float32),
        grid=(B, S // TS, inner // TI),
        in_specs=in_specs,
        out_specs=pl.BlockSpec((1, TS, D), lambda b, s, k: (b, s, 0)),
        scratch_shapes=[pltpu.VMEM((TS, D), jnp.bfloat16),   # cached LN(x)
                        pltpu.VMEM((TS, D), jnp.float32)],   # residual/FF accumulator
        compiler_params=pltpu.CompilerParams(
            dimension_semantics=("parallel", "parallel", "arbitrary"),
            vmem_limit_bytes=VMEM_LIMIT),
    )(*args)


def _self_attn(h, a, n, *, heads, head_dim, seq_tile, kv_tile):
    q, k, v = project_heads(h, [a["wq"], a["wk"], a["wv"]], n["g"], n["b"],
                            heads=heads, head_dim=head_dim, apply_ln=True,
                            seq_tile=seq_tile)
    return flash_attn_block(h, q, k, v, a["wo"], a["bo"], heads=heads, head_dim=head_dim,
                            seq_tile=seq_tile, kv_tile=kv_tile)


def _cross_attn(h, ctx, a, n, *, heads, head_dim, seq_tile, kv_tile):
    (q,) = project_heads(h, [a["wq"]], n["g"], n["b"], heads=heads, head_dim=head_dim,
                         apply_ln=True, seq_tile=seq_tile)
    # K/V from the context stream: no LayerNorm; DMA it in bf16 (halves the bytes).
    k, v = project_heads(ctx.astype(jnp.bfloat16), [a["wk"], a["wv"]],
                         heads=heads, head_dim=head_dim, apply_ln=False,
                         seq_tile=seq_tile)
    return flash_attn_block(h, q, k, v, a["wo"], a["bo"], heads=heads, head_dim=head_dim,
                            seq_tile=seq_tile, kv_tile=kv_tile)


# ----------------------------------------------------------------------------- full block
def basic_transformer_block(prep, hidden_states, encoder_hidden_states=None,
                            context_tokens=None, *, heads, head_dim,
                            seq_tile=None, kv_tile=None, inner_tile=None):
    # TODO(synk): attention_mask / encoder_attention_mask handling (None in this call path).
    h = hidden_states.astype(jnp.float32)   # residual stream kept f32 between calls

    # attn1: self-attention on norm1(h)
    h = _self_attn(h, prep["attn1"], prep["norm1"], heads=heads, head_dim=head_dim,
                   seq_tile=seq_tile, kv_tile=kv_tile)

    if context_tokens is not None:
        h = _cross_attn(h, context_tokens, prep["attn_extra"], prep["norm_extra"],
                        heads=heads, head_dim=head_dim, seq_tile=seq_tile, kv_tile=kv_tile)
        h = ln_ff_block(h, prep["norm_ff_extra"], prep["ff_extra"], adapter=None,
                        seq_tile=seq_tile, inner_tile=inner_tile)

    if encoder_hidden_states is not None:
        h = _cross_attn(h, encoder_hidden_states, prep["attn2"], prep["norm2"],
                        heads=heads, head_dim=head_dim, seq_tile=seq_tile, kv_tile=kv_tile)
    else:
        h = _self_attn(h, prep["attn2"], prep["norm2"], heads=heads, head_dim=head_dim,
                       seq_tile=seq_tile, kv_tile=kv_tile)

    h = ln_ff_block(h, prep["norm3"], prep["ff"], adapter=prep["adapter"],
                    seq_tile=seq_tile, inner_tile=inner_tile)
    return h


# ----------------------------------------------------------------------------- params
def init_params(key, dim, heads, head_dim, ff_inner):
    keys = iter(jax.random.split(key, 64))

    def lin(din, dout, scale=0.02):
        return jax.random.normal(next(keys), (din, dout), jnp.float32) * scale

    def vec(d, scale=0.02):
        return jax.random.normal(next(keys), (d,), jnp.float32) * scale

    DI = heads * head_dim
    p = {}
    for name in ("norm1", "norm_extra", "norm_ff_extra", "norm2", "norm3"):
        p[name] = {"g": jnp.ones((dim,), jnp.float32), "b": jnp.zeros((dim,), jnp.float32)}
    # attention_bias=False (no q/k/v bias); out_bias=True
    for name in ("attn1", "attn_extra", "attn2"):
        p[name] = {"wq": lin(dim, DI), "wk": lin(dim, DI), "wv": lin(dim, DI),
                   "wo": lin(DI, dim), "bo": vec(dim)}
    # GEGLU feed-forwards: proj (dim -> 2*inner), out (inner -> dim)
    for name in ("ff_extra", "ff"):
        p[name] = {"w1": lin(dim, 2 * ff_inner), "b1": vec(2 * ff_inner),
                   "w2": lin(ff_inner, dim), "b2": vec(dim)}
    # Adapter: fc1 (dim -> dim/2), fc2 zero-initialized (nn.init.constant_ 0)
    ah = dim // 2
    p["adapter"] = {"w1": lin(dim, ah), "b1": vec(ah),
                    "w2": jnp.zeros((ah, dim), jnp.float32),
                    "b2": jnp.zeros((dim,), jnp.float32)}
    return p


def prepare_params(params, *, heads, head_dim):
    """One-time weight prep: bf16 casts, softmax scale folded into wq, GEGLU split,
    biases reshaped — no per-step weight re-cast traffic."""
    bf = jnp.bfloat16
    scale = 1.0 / math.sqrt(head_dim)

    def prep_norm(n):
        return {"g": n["g"].reshape(1, -1).astype(jnp.float32),
                "b": n["b"].reshape(1, -1).astype(jnp.float32)}

    def prep_attn(a):
        return {"wq": (a["wq"] * scale).astype(bf), "wk": a["wk"].astype(bf),
                "wv": a["wv"].astype(bf), "wo": a["wo"].astype(bf),
                "bo": a["bo"].reshape(1, -1).astype(jnp.float32)}

    def prep_ff(f):
        inner = f["w2"].shape[0]
        return {"w_val": f["w1"][:, :inner].astype(bf),
                "w_gate": f["w1"][:, inner:].astype(bf),
                "b_val": f["b1"][:inner].reshape(1, -1).astype(jnp.float32),
                "b_gate": f["b1"][inner:].reshape(1, -1).astype(jnp.float32),
                "w2": f["w2"].astype(bf),
                "b2": f["b2"].reshape(1, -1).astype(jnp.float32)}

    def prep_adapter(ad):
        return {"w1": ad["w1"].astype(bf), "b1": ad["b1"].reshape(1, -1).astype(jnp.float32),
                "w2": ad["w2"].astype(bf), "b2": ad["b2"].reshape(1, -1).astype(jnp.float32)}

    out = {}
    for name in ("norm1", "norm_extra", "norm_ff_extra", "norm2", "norm3"):
        out[name] = prep_norm(params[name])
    for name in ("attn1", "attn_extra", "attn2"):
        out[name] = prep_attn(params[name])
    for name in ("ff_extra", "ff"):
        out[name] = prep_ff(params[name])
    out["adapter"] = prep_adapter(params["adapter"])
    return out


# ----------------------------------------------------------------------------- pure-JAX reference
def _ref_attn(nx, kv, a, heads, head_dim):
    B, S, _ = nx.shape
    Skv = kv.shape[1]
    q = nx @ a["wq"]
    k = kv @ a["wk"]
    v = kv @ a["wv"]
    qh = q.reshape(B, S, heads, head_dim).transpose(0, 2, 1, 3)
    kh = k.reshape(B, Skv, heads, head_dim).transpose(0, 2, 1, 3)
    vh = v.reshape(B, Skv, heads, head_dim).transpose(0, 2, 1, 3)
    s = jnp.einsum("bhqd,bhkd->bhqk", qh, kh) / math.sqrt(head_dim)
    pmat = jax.nn.softmax(s, axis=-1)
    o = jnp.einsum("bhqk,bhkd->bhqd", pmat, vh).transpose(0, 2, 1, 3).reshape(B, S, heads * head_dim)
    return o @ a["wo"] + a["bo"]


def _ref_geglu_ff(nx, f):
    h = nx @ f["w1"] + f["b1"]
    inner = f["w2"].shape[0]
    val, gate = h[..., :inner], h[..., inner:]
    return (val * jax.nn.gelu(gate, approximate=False)) @ f["w2"] + f["b2"]


def ref_forward(params, x, enc, ctx, heads, head_dim):
    def ln(x, n):
        return _ln(x, n["g"], n["b"], EPS)

    h = x
    h = _ref_attn(ln(h, params["norm1"]), ln(h, params["norm1"]), params["attn1"], heads, head_dim) + h
    if ctx is not None:
        h = _ref_attn(ln(h, params["norm_extra"]), ctx, params["attn_extra"], heads, head_dim) + h
        h = _ref_geglu_ff(ln(h, params["norm_ff_extra"]), params["ff_extra"]) + h
    kv = enc if enc is not None else ln(h, params["norm2"])
    h = _ref_attn(ln(h, params["norm2"]), kv, params["attn2"], heads, head_dim) + h
    ad = params["adapter"]
    adapter_out = jax.nn.gelu(h @ ad["w1"] + ad["b1"], approximate=False) @ ad["w2"] + ad["b2"]
    h = _ref_geglu_ff(ln(h, params["norm3"]), params["ff"]) + h + adapter_out
    return h


# ----------------------------------------------------------------------------- main
if __name__ == "__main__":
    dim, heads, head_dim = 64, 2, 32            # DI = 64 (production: use multiples of 128)
    ff_inner = 512                              # explicit ff_inner_dim (GEGLU inner)
    B, S, S_ctx, S_enc = 2, 16, 8, 16

    key = jax.random.PRNGKey(0)
    kp, kx, ke, kc = jax.random.split(key, 4)

    params = init_params(kp, dim, heads, head_dim, ff_inner)
    prep = prepare_params(params, heads=heads, head_dim=head_dim)
    hidden_states = jax.random.normal(kx, (B, S, dim), jnp.float32)
    encoder_hidden_states = jax.random.normal(ke, (B, S_enc, dim), jnp.float32)
    context_tokens = jax.random.normal(kc, (B, S_ctx, dim), jnp.float32)

    # Small tiles so the multi-tile query path, the multi-step online-softmax kv path and
    # the inner-dim reduction path are all exercised; production defaults are 256/512/512.
    out = basic_transformer_block(prep, hidden_states,
                                  encoder_hidden_states=encoder_hidden_states,
                                  context_tokens=context_tokens,
                                  heads=heads, head_dim=head_dim,
                                  seq_tile=8, kv_tile=8, inner_tile=256)
    out = jax.block_until_ready(out)

    ref = ref_forward(params, hidden_states, encoder_hidden_states, context_tokens,
                      heads, head_dim)
    # bf16 matmul operands / bf16 Q,K,V intermediates -> slightly looser tolerance
    np.testing.assert_allclose(np.asarray(out), np.asarray(ref), rtol=2e-2, atol=2e-2)

    print("KERNEL_OK")
</pallas_src>

<mosaic_0001>
module attributes {stable_mosaic.version = 11 : i64} {
  func.func @_proj_kernel(%arg0: i32, %arg1: i32, %arg2: memref<1x8x64xf32, #tpu.memory_space<vmem>>, %arg3: memref<1x64xf32, #tpu.memory_space<vmem>>, %arg4: memref<1x64xf32, #tpu.memory_space<vmem>>, %arg5: memref<64x64xbf16, #tpu.memory_space<vmem>>, %arg6: memref<64x64xbf16, #tpu.memory_space<vmem>>, %arg7: memref<64x64xbf16, #tpu.memory_space<vmem>>, %arg8: memref<1x2x8x32xbf16, #tpu.memory_space<vmem>>, %arg9: memref<1x2x8x32xbf16, #tpu.memory_space<vmem>>, %arg10: memref<1x2x8x32xbf16, #tpu.memory_space<vmem>>) attributes {dimension_semantics = [#tpu.dimension_semantics<parallel>, #tpu.dimension_semantics<parallel>], iteration_bounds = array<i64: 2, 2>, scalar_prefetch = 0 : i64, scratch_operands = 0 : i64, tpu.core_type = #tpu.core_type<tc>, window_params = [{transform_indices = @transform_0, window_bounds = array<i64: 1, 8, 64>}, {pipeline_mode = #tpu.pipeline_mode<synchronous>, transform_indices = @transform_1, window_bounds = array<i64: 1, 64>}, {pipeline_mode = #tpu.pipeline_mode<synchronous>, transform_indices = @transform_2, window_bounds = array<i64: 1, 64>}, {pipeline_mode = #tpu.pipeline_mode<synchronous>, transform_indices = @transform_3, window_bounds = array<i64: 64, 64>}, {pipeline_mode = #tpu.pipeline_mode<synchronous>, transform_indices = @transform_4, window_bounds = array<i64: 64, 64>}, {pipeline_mode = #tpu.pipeline_mode<synchronous>, transform_indices = @transform_5, window_bounds = array<i64: 64, 64>}, {transform_indices = @transform_6, window_bounds = array<i64: 1, 2, 8, 32>}, {transform_indices = @transform_7, window_bounds = array<i64: 1, 2, 8, 32>}, {transform_indices = @transform_8, window_bounds = array<i64: 1, 2, 8, 32>}]} {
    %c0 = arith.constant 0 : index
    %c0_0 = arith.constant 0 : index
    %c0_1 = arith.constant 0 : index
    %0 = vector.load %arg2[%c0, %c0_0, %c0_1] : memref<1x8x64xf32, #tpu.memory_space<vmem>>, vector<1x8x64xf32>
    %1 = vector.shape_cast %0 : vector<1x8x64xf32> to vector<8x64xf32>
    %c0_2 = arith.constant 0 : index
    %c0_3 = arith.constant 0 : index
    %2 = vector.load %arg3[%c0_2, %c0_3] : memref<1x64xf32, #tpu.memory_space<vmem>>, vector<1x64xf32>
    %3 = vector.shape_cast %2 : vector<1x64xf32> to vector<64xf32>
    %c0_4 = arith.constant 0 : index
    %c0_5 = arith.constant 0 : index
    %4 = vector.load %arg4[%c0_4, %c0_5] : memref<1x64xf32, #tpu.memory_space<vmem>>, vector<1x64xf32>
    %5 = vector.shape_cast %4 : vector<1x64xf32> to vector<64xf32>
    %cst = arith.constant dense<0.000000e+00> : vector<8xf32>
    %6 = vector.multi_reduction <add>, %1, %cst [1] : vector<8x64xf32> to vector<8xf32>
    %7 = vector.shape_cast %6 : vector<8xf32> to vector<8x1xf32>
    %cst_6 = arith.constant 6.400000e+01 : f32
    %8 = vector.broadcast %cst_6 : f32 to vector<8x1xf32>
    %9 = arith.divf %7, %8 : vector<8x1xf32>
    %10 = vector.broadcast %9 : vector<8x1xf32> to vector<8x64xf32>
    %11 = arith.subf %1, %10 : vector<8x64xf32>
    %12 = arith.mulf %11, %11 : vector<8x64xf32>
    %cst_7 = arith.constant dense<0.000000e+00> : vector<8xf32>
    %13 = vector.multi_reduction <add>, %12, %cst_7 [1] : vector<8x64xf32> to vector<8xf32>
    %14 = vector.shape_cast %13 : vector<8xf32> to vector<8x1xf32>
    %cst_8 = arith.constant 6.400000e+01 : f32
    %15 = vector.broadcast %cst_8 : f32 to vector<8x1xf32>
    %16 = arith.divf %14, %15 : vector<8x1xf32>
    %17 = vector.broadcast %9 : vector<8x1xf32> to vector<8x64xf32>
    %18 = arith.subf %1, %17 : vector<8x64xf32>
    %cst_9 = arith.constant 9.99999974E-6 : f32
    %19 = vector.broadcast %cst_9 : f32 to vector<8x1xf32>
    %20 = arith.addf %16, %19 : vector<8x1xf32>
    %21 = math.rsqrt %20 : vector<8x1xf32>
    %22 = vector.broadcast %21 : vector<8x1xf32> to vector<8x64xf32>
    %23 = arith.mulf %18, %22 : vector<8x64xf32>
    %24 = vector.shape_cast %3 : vector<64xf32> to vector<1x64xf32>
    %25 = vector.broadcast %24 : vector<1x64xf32> to vector<8x64xf32>
    %26 = arith.mulf %23, %25 : vector<8x64xf32>
    %27 = vector.shape_cast %5 : vector<64xf32> to vector<1x64xf32>
    %28 = vector.broadcast %27 : vector<1x64xf32> to vector<8x64xf32>
    %29 = arith.addf %26, %28 : vector<8x64xf32>
    %30 = arith.truncf %29 : vector<8x64xf32> to vector<8x64xbf16>
    %c0_10 = arith.constant 0 : index
    %c0_11 = arith.constant 0 : index
    %31 = vector.load %arg5[%c0_10, %c0_11] : memref<64x64xbf16, #tpu.memory_space<vmem>>, vector<64x64xbf16>
    %cst_12 = arith.constant dense<0.000000e+00> : vector<8x64xf32>
    %32 = tpu.matmul %30, %31, %cst_12 {dimension_numbers = #tpu.dot_dimension_numbers<[1], [0], [0], [1], [0, 0, 1, 1], [], []>} : vector<8x64xbf16>, vector<64x64xbf16>, vector<8x64xf32> -> vector<8x64xf32>
    %33 = vector.extract_strided_slice %32 {offsets = [0, 0], sizes = [8, 32], strides = [1, 1]} : vector<8x64xf32> to vector<8x32xf32>
    %34 = arith.truncf %33 : vector<8x32xf32> to vector<8x32xbf16>
    %c0_13 = arith.constant 0 : index
    %c0_14 = arith.constant 0 : index
    %c0_15 = arith.constant 0 : index
    %c0_16 = arith.constant 0 : index
    %35 = vector.load %arg8[%c0_13, %c0_14, %c0_15, %c0_16] : memref<1x2x8x32xbf16, #tpu.memory_space<vmem>>, vector<1x1x8x32xbf16>
    %36 = vector.shape_cast %35 : vector<1x1x8x32xbf16> to vector<8x32xbf16>
    %37 = vector.shape_cast %34 : vector<8x32xbf16> to vector<1x1x8x32xbf16>
    tpu.vector_store %arg8[%c0_13, %c0_14, %c0_15, %c0_16], %37 {strides = array<i32>} : memref<1x2x8x32xbf16, #tpu.memory_space<vmem>>, vector<1x1x8x32xbf16>,
    %38 = vector.extract_strided_slice %32 {offsets = [0, 32], sizes = [8, 32], strides = [1, 1]} : vector<8x64xf32> to vector<8x32xf32>
    %39 = arith.truncf %38 : vector<8x32xf32> to vector<8x32xbf16>
    %c0_17 = arith.constant 0 : index
    %c1 = arith.constant 1 : index
    %c0_18 = arith.constant 0 : index
    %c0_19 = arith.constant 0 : index
    %40 = vector.load %arg8[%c0_17, %c1, %c0_18, %c0_19] : memref<1x2x8x32xbf16, #tpu.memory_space<vmem>>, vector<1x1x8x32xbf16>
    %41 = vector.shape_cast %40 : vector<1x1x8x32xbf16> to vector<8x32xbf16>
    %42 = vector.shape_cast %39 : vector<8x32xbf16> to vector<1x1x8x32xbf16>
    tpu.vector_store %arg8[%c0_17, %c1, %c0_18, %c0_19], %42 {strides = array<i32>} : memref<1x2x8x32xbf16, #tpu.memory_space<vmem>>, vector<1x1x8x32xbf16>,
    %c0_20 = arith.constant 0 : index
    %c0_21 = arith.constant 0 : index
    %43 = vector.load %arg6[%c0_20, %c0_21] : memref<64x64xbf16, #tpu.memory_space<vmem>>, vector<64x64xbf16>
    %cst_22 = arith.constant dense<0.000000e+00> : vector<8x64xf32>
    %44 = tpu.matmul %30, %43, %cst_22 {dimension_numbers = #tpu.dot_dimension_numbers<[1], [0], [0], [1], [0, 0, 1, 1], [], []>} : vector<8x64xbf16>, vector<64x64xbf16>, vector<8x64xf32> -> vector<8x64xf32>
    %45 = vector.extract_strided_slice %44 {offsets = [0, 0], sizes = [8, 32], strides = [1, 1]} : vector<8x64xf32> to vector<8x32xf32>
    %46 = arith.truncf %45 : vector<8x32xf32> to vector<8x32xbf16>
    %c0_23 = arith.constant 0 : index
    %c0_24 = arith.constant 0 : index
    %c0_25 = arith.constant 0 : index
    %c0_26 = arith.constant 0 : index
    %47 = vector.load %arg9[%c0_23, %c0_24, %c0_25, %c0_26] : memref<1x2x8x32xbf16, #tpu.memory_space<vmem>>, vector<1x1x8x32xbf16>
    %48 = vector.shape_cast %47 : vector<1x1x8x32xbf16> to vector<8x32xbf16>
    %49 = vector.shape_cast %46 : vector<8x32xbf16> to vector<1x1x8x32xbf16>
    tpu.vector_store %arg9[%c0_23, %c0_24, %c0_25, %c0_26], %49 {strides = array<i32>} : memref<1x2x8x32xbf16, #tpu.memory_space<vmem>>, vector<1x1x8x32xbf16>,
    %50 = vector.extract_strided_slice %44 {offsets = [0, 32], sizes = [8, 32], strides = [1, 1]} : vector<8x64xf32> to vector<8x32xf32>
    %51 = arith.truncf %50 : vector<8x32xf32> to vector<8x32xbf16>
    %c0_27 = arith.constant 0 : index
    %c1_28 = arith.constant 1 : index
    %c0_29 = arith.constant 0 : index
    %c0_30 = arith.constant 0 : index
    %52 = vector.load %arg9[%c0_27, %c1_28, %c0_29, %c0_30] : memref<1x2x8x32xbf16, #tpu.memory_space<vmem>>, vector<1x1x8x32xbf16>
    %53 = vector.shape_cast %52 : vector<1x1x8x32xbf16> to vector<8x32xbf16>
    %54 = vector.shape_cast %51 : vector<8x32xbf16> to vector<1x1x8x32xbf16>
    tpu.vector_store %arg9[%c0_27, %c1_28, %c0_29, %c0_30], %54 {strides = array<i32>} : memref<1x2x8x32xbf16, #tpu.memory_space<vmem>>, vector<1x1x8x32xbf16>,
    %c0_31 = arith.constant 0 : index
    %c0_32 = arith.constant 0 : index
    %55 = vector.load %arg7[%c0_31, %c0_32] : memref<64x64xbf16, #tpu.memory_space<vmem>>, vector<64x64xbf16>
    %cst_33 = arith.constant dense<0.000000e+00> : vector<8x64xf32>
    %56 = tpu.matmul %30, %55, %cst_33 {dimension_numbers = #tpu.dot_dimension_numbers<[1], [0], [0], [1], [0, 0, 1, 1], [], []>} : vector<8x64xbf16>, vector<64x64xbf16>, vector<8x64xf32> -> vector<8x64xf32>
    %57 = vector.extract_strided_slice %56 {offsets = [0, 0], sizes = [8, 32], strides = [1, 1]} : vector<8x64xf32> to vector<8x32xf32>
    %58 = arith.truncf %57 : vector<8x32xf32> to vector<8x32xbf16>
    %c0_34 = arith.constant 0 : index
    %c0_35 = arith.constant 0 : index
    %c0_36 = arith.constant 0 : index
    %c0_37 = arith.constant 0 : index
    %59 = vector.load %arg10[%c0_34, %c0_35, %c0_36, %c0_37] : memref<1x2x8x32xbf16, #tpu.memory_space<vmem>>, vector<1x1x8x32xbf16>
    %60 = vector.shape_cast %59 : vector<1x1x8x32xbf16> to vector<8x32xbf16>
    %61 = vector.shape_cast %58 : vector<8x32xbf16> to vector<1x1x8x32xbf16>
    tpu.vector_store %arg10[%c0_34, %c0_35, %c0_36, %c0_37], %61 {strides = array<i32>} : memref<1x2x8x32xbf16, #tpu.memory_space<vmem>>, vector<1x1x8x32xbf16>,
    %62 = vector.extract_strided_slice %56 {offsets = [0, 32], sizes = [8, 32], strides = [1, 1]} : vector<8x64xf32> to vector<8x32xf32>
    %63 = arith.truncf %62 : vector<8x32xf32> to vector<8x32xbf16>
    %c0_38 = arith.constant 0 : index
    %c1_39 = arith.constant 1 : index
    %c0_40 = arith.constant 0 : index
    %c0_41 = arith.constant 0 : index
    %64 = vector.load %arg10[%c0_38, %c1_39, %c0_40, %c0_41] : memref<1x2x8x32xbf16, #tpu.memory_space<vmem>>, vector<1x1x8x32xbf16>
    %65 = vector.shape_cast %64 : vector<1x1x8x32xbf16> to vector<8x32xbf16>
    %66 = vector.shape_cast %63 : vector<8x32xbf16> to vector<1x1x8x32xbf16>
    tpu.vector_store %arg10[%c0_38, %c1_39, %c0_40, %c0_41], %66 {strides = array<i32>} : memref<1x2x8x32xbf16, #tpu.memory_space<vmem>>, vector<1x1x8x32xbf16>,
    return
  }
  func.func @transform_0(%arg0: i32, %arg1: i32) -> (i32, i32, i32) {
    %c0_i32 = arith.constant 0 : i32
    %c0_i32_0 = arith.constant 0 : i32
    return %arg0, %arg1, %c0_i32 : i32, i32, i32
  }
  func.func @transform_1(%arg0: i32, %arg1: i32) -> (i32, i32) {
    %c0_i32 = arith.constant 0 : i32
    %c0_i32_0 = arith.constant 0 : i32
    %c0_i32_1 = arith.constant 0 : i32
    return %c0_i32, %c0_i32_0 : i32, i32
  }
  func.func @transform_2(%arg0: i32, %arg1: i32) -> (i32, i32) {
    %c0_i32 = arith.constant 0 : i32
    %c0_i32_0 = arith.constant 0 : i32
    %c0_i32_1 = arith.constant 0 : i32
    return %c0_i32, %c0_i32_0 : i32, i32
  }
  func.func @transform_3(%arg0: i32, %arg1: i32) -> (i32, i32) {
    %c0_i32 = arith.constant 0 : i32
    %c0_i32_0 = arith.constant 0 : i32
    %c0_i32_1 = arith.constant 0 : i32
    return %c0_i32, %c0_i32_0 : i32, i32
  }
  func.func @transform_4(%arg0: i32, %arg1: i32) -> (i32, i32) {
    %c0_i32 = arith.constant 0 : i32
    %c0_i32_0 = arith.constant 0 : i32
    %c0_i32_1 = arith.constant 0 : i32
    return %c0_i32, %c0_i32_0 : i32, i32
  }
  func.func @transform_5(%arg0: i32, %arg1: i32) -> (i32, i32) {
    %c0_i32 = arith.constant 0 : i32
    %c0_i32_0 = arith.constant 0 : i32
    %c0_i32_1 = arith.constant 0 : i32
    return %c0_i32, %c0_i32_0 : i32, i32
  }
  func.func @transform_6(%arg0: i32, %arg1: i32) -> (i32, i32, i32, i32) {
    %c0_i32 = arith.constant 0 : i32
    %c0_i32_0 = arith.constant 0 : i32
    %c0_i32_1 = arith.constant 0 : i32
    return %arg0, %c0_i32, %arg1, %c0_i32_0 : i32, i32, i32, i32
  }
  func.func @transform_7(%arg0: i32, %arg1: i32) -> (i32, i32, i32, i32) {
    %c0_i32 = arith.constant 0 : i32
    %c0_i32_0 = arith.constant 0 : i32
    %c0_i32_1 = arith.constant 0 : i32
    return %arg0, %c0_i32, %arg1, %c0_i32_0 : i32, i32, i32, i32
  }
  func.func @transform_8(%arg0: i32, %arg1: i32) -> (i32, i32, i32, i32) {
    %c0_i32 = arith.constant 0 : i32
    %c0_i32_0 = arith.constant 0 : i32
    %c0_i32_1 = arith.constant 0 : i32
    return %arg0, %c0_i32, %arg1, %c0_i32_0 : i32, i32, i32, i32
  }
}

</mosaic_0001>

<bundles_post_ra>
// kernel: tpu_custom_call.1
= control target key start
LH: loop header
LB: loop body
LE: loop exit
PB: predicated region body
PF: predicated region fallthrough
CT: control target
= control target key end

     0   :  { %s1840_s0 = inlined_call_operand.hbm [shape: f32[2,16,64], index: 0, kind: input, shape index: {}]   ;;  %s1841_s1 = inlined_call_operand.vmem [shape: f32[1,64], index: 1, kind: input, shape index: {}]   ;;  %s1842_s2 = inlined_call_operand.vmem [shape: f32[1,64], index: 2, kind: input, shape index: {}]   ;;  %s1843_s3 = inlined_call_operand.hbm [shape: bf16[64,64], index: 3, kind: input, shape index: {}]   ;;  %s1844_s4 = inlined_call_operand.hbm [shape: bf16[64,64], index: 4, kind: input, shape index: {}]   ;;  %s1845_s5 = inlined_call_operand.hbm [shape: bf16[64,64], index: 5, kind: input, shape index: {}]   ;;  %s1846_s6 = inlined_call_operand.hbm [shape: bf16[2,2,16,32], index: 6, kind: output, shape index: {0}]   ;;  %s1847_s7 = inlined_call_operand.hbm [shape: bf16[2,2,16,32], index: 7, kind: output, shape index: {1}]   ;;  %s1848_s8 = inlined_call_operand.hbm [shape: bf16[2,2,16,32], index: 8, kind: output, shape index: {2}]  }
   0x1   :  { %1860 = sst [smem:[#allocation23_spill]] %s1840_s0 }
   0x2   :  { %1861 = sst [smem:[#allocation24_spill]] %s1843_s3 }
   0x3   :  { %1862 = sst [smem:[#allocation25_spill]] %s1844_s4 }
   0x4   :  { %1863 = sst [smem:[#allocation26_spill]] %s1845_s5 }
   0x5   :  { %1864 = sst [smem:[#allocation27_spill]] %s1846_s6 }
   0x6   :  { %1865 = sst [smem:[#allocation28_spill]] %s1847_s7 }
   0x7   :  { %1866 = sst [smem:[#allocation29_spill]] %s1848_s8 }
   0x8   :  { %14 = vsyncpa [#allocation3], 0 }
   0x9   :  { %16 = vsyncpa [#allocation3 + $0x1], 0 }
   0xa   :  { %17 = vsyncpa [#allocation6], 0 }
   0xb   :  { %18 = vsyncpa [#allocation9], 0 }
   0xc   :  { %19 = vsyncpa [#allocation4], 0 }
   0xd   :  { %21 = vsyncpa [#allocation4 + $0x1], 0 }
   0xe   :  { %22 = vsyncpa [#allocation12], 0 }
   0xf   :  { %24 = vsyncpa [#allocation12 + $0x1], 0  ;;  %s1505_s27 = smov 0   ;;  %s1507_s28 = smov 0  }
  0x10   :  { %s1509_s29 = smov 0   ;;  %s1511_s30 = smov 0  }
  0x11   :  { %s1513_s9 = smov 0   ;;  %s1515_s10 = smov 0  }
  0x12   :  { %s1517_s11 = smov 0   ;;  %s1519_s12 = smov 0  }
  0x13 LB: > { %1867 = sst [smem:[#allocation19_spill]] %s1415_s27  ;;  %s1546_s13 = sadd.s32 4294967295, %s1443_s12   ;;  %s1443_s12 = sphi %s1519_s12, %s30_s12   ;;  %s1439_s11 = sphi %s1517_s11, %s1904_s11   ;;  %s1435_s10 = sphi %s1515_s10, %s1903_s10   ;;  %s1431_s9 = sphi %s1513_s9, %s1902_s9   ;;  %s1427_s30 = sphi %s1511_s30, %s1901_s30   ;;  %s1423_s29 = sphi %s1509_s29, %s1900_s29   ;;  %s1419_s28 = sphi %s1507_s28, %s1899_s28   ;;  %s1415_s27 = sphi %s1505_s27, %s1898_s27  }
  0x14   : > { %s1849_s14 = sadd.s32 4294967294, %s1443_s12   ;;  %p64_p0 = scmp.ne.s32.totalorder %s1419_s28, %s1415_s27 }
  0x15   : > { %p1850_p1 = scmp.eq.s32.totalorder %s1546_s13, 0  ;;  %p201_p3 = scmp.eq.s32.totalorder %s1849_s14, 3 }
  0x16   : > { %p932_p5 = scmp.ge.s32.totalorder %s1443_s12, 1  ;;  %p264_p7 = scmp.lt.s32.totalorder %s1443_s12, 5 }
  0x17   : > { %p1557_p4 = por %p1850_p1, %p64_p0  ;;  %p1562_p6 = por %p201_p3, %p64_p0 }
  0x18   : > { %p1567_p8 = pnand %p932_p5, %p264_p7  ;;  %s1445_s18 = smov [#allocation5]  }
  0x19   : > { %s1868_s15 = scalar_select %p1557_p4, 1, 0 }
  0x1a   : > { %s1869_s16 = scalar_select %p1562_p6, 1, 0 }
  0x1b   : > { %s282_s19 = sshll.u32 %s1445_s18, 4  ;;  %p1056_p9 = pneg %p1567_p8  ;;  %s283_s19 = int_to_ptr.vmem [resolvable:$true] %s282_s19 }
  0x1c   : > { %1870 = sst [smem:[#allocation20_spill]] %s1869_s16  ;;  %s1446_s21 = smov [#allocation7]  }
  0x1d   : > { %p1575_p10 = pnand %p1056_p9, %p1850_p1  ;;  %s295_s22 = sshll.u32 %s1446_s21, 4  ;;  %s296_s22 = int_to_ptr.vmem [resolvable:$true] %s295_s22 }
  0x1e   : > { %s1447_s23 = smov [#allocation8]   ;;  %s1188_s25 = scalar_lea.vmem %s283_s19, 512 }
  0x1f   : > { %s308_s24 = sshll.u32 %s1447_s23, 4  ;;  %p1179_p11 = pneg %p1575_p10  ;;  %s309_s24 = int_to_ptr.vmem [resolvable:$true] %s308_s24 }
  0x20   : > { %p1189_p12 = scmp.ne.s32.totalorder %s283_s19, %s1188_s25  ;;  %p1196_p3 = scmp.lt.s32.totalorder %s283_s19, %s283_s19 }
  0x21   : > { %p1197_p5 = scmp.lt.s32.totalorder %s1188_s25, %s1188_s25 }
  0x22   : > { %p1191_p13 = pnand %p1189_p12, %p1179_p11 }
  0x23   : > { %p1198_p7 = por %p1197_p5, %p1196_p3 }
  0x24   : > { %p1192_p0 = pneg %p1191_p13 }
  0x26   : > { %p1199_p9 = pnand %p1198_p7, %p1192_p0 }
  0x28   : > { %1202 = shalt.err (!%p1199_p9)
}
  0x29   : > { %s1448_s26 = smov 64   ;;  %s1449_s18 = smov 4  }
  0x2a   : > { %s1873_s3 = sld [smem:[#allocation24_spill]]  ;;  %s1214_s14 = scalar_lea.vmem %s296_s22, 512 }
  0x2b   : > { %p1215_p1 = scmp.ne.s32.totalorder %s296_s22, %s1214_s14  ;;  %p1222_p2 = scmp.lt.s32.totalorder %s296_s22, %s296_s22 }
  0x2c   : > { %p1223_p6 = scmp.lt.s32.totalorder %s1214_s14, %s1214_s14 }
  0x2d   : > { %p1217_p12 = pnand %p1215_p1, %p1179_p11 }
  0x2e   : > { %p1224_p3 = por %p1223_p6, %p1222_p2 }
  0x2f   : > { %p1218_p13 = pneg %p1217_p12 }
  0x30   : > { %1059 = dma.hbm_to_vmem [thread:$0]  (!%p1575_p10), %s1873_s3, 512, %s283_s19, [#allocation6], %s1448_s26, %s1448_s26, %s1449_s18  }
  0x31   : > { %p1225_p0 = pnand %p1224_p3, %p1218_p13 }
  0x33   : > { %1228 = shalt.err (!%p1225_p0)
}
  0x34   : > { %s1874_s4 = sld [smem:[#allocation25_spill]]  ;;  %s1240_s19 = scalar_lea.vmem %s309_s24, 512 }
  0x35   : > { %p1241_p5 = scmp.ne.s32.totalorder %s309_s24, %s1240_s19  ;;  %p1248_p9 = scmp.lt.s32.totalorder %s309_s24, %s309_s24 }
  0x36   : > { %p1249_p12 = scmp.lt.s32.totalorder %s1240_s19, %s1240_s19 }
  0x37   : > { %p1243_p7 = pnand %p1241_p5, %p1179_p11 }
  0x38   : > { %p1250_p4 = por %p1249_p12, %p1248_p9 }
  0x39   : > { %p1244_p1 = pneg %p1243_p7 }
  0x3a   : > { %1062 = dma.hbm_to_vmem [thread:$0]  (!%p1575_p10), %s1874_s4, 512, %s296_s22, [#allocation6], %s1448_s26, %s1448_s26, %s1449_s18  }
  0x3b   : > { %p1251_p2 = pnand %p1250_p4, %p1244_p1 }
  0x3d   : > { %1254 = shalt.err (!%p1251_p2)
}
  0x3e   : > { %s1875_s5 = sld [smem:[#allocation26_spill]]  ;;  %s39_s16 = sadd.s32 1, %s1435_s10 }
  0x3f   : > { %p40_p4 = scmp.ge.s32.totalorder %s39_s16, 2  ;;  %s42_s20 = sadd.s32 1, %s1439_s11 }
  0x40   : > { %s51_s22 = sadd.s32 1, %s1423_s29  ;;  %p58_p6 = scmp.ne.s32.totalorder %s1423_s29, %s1419_s28 }
  0x41   : > { %s1906_s16 = smov (%p40_p4, %s39_s16), 0  ;;  %s1908_s20 = smov (!%p40_p4, %s42_s20), %s1439_s11 }
  0x42   : > { %1876 = sst [smem:[#allocation21_spill]] %s1906_s16  ;;  %s47_s23 = ssub.s32 %s1435_s10, %s1906_s16 }
  0x43   : > { %p59_p11 = scmp.eq.s32.totalorder %s1443_s12, 0  ;;  %p44_p13 = scmp.ge.s32.totalorder %s1908_s20, 2 }
  0x44   : > { %1065 = dma.hbm_to_vmem [thread:$0]  (!%p1575_p10), %s1875_s5, 512, %s309_s24, [#allocation9], %s1448_s26, %s1448_s26, %s1449_s18  }
  0x45   : > { %p1877_p3 = scmp.eq.s32.totalorder %s1546_s13, 3  ;;  %p1622_p10 = por %p59_p11, %p58_p6 }
  0x46   : > { %p1083_p5 = scmp.lt.s32.totalorder %s1443_s12, 4  ;;  %s1910_s20 = smov (%p44_p13, %s1908_s20), 0 }
  0x47   : > { %p1618_p0 = por %p1877_p3, %p58_p6  ;;  %s322_s26 = sand.u32 1, %s1423_s29  }
  0x48   : > { %s938_s18 = sshll.u32 %s1439_s11, 1  ;;  %s46_s19 = ssub.s32 %s1439_s11, %s1910_s20 }
  0x49   : > { %s1878_s25 = scalar_select %p1618_p0, 1, 0 }
  0x4a   : > { %s48_s14 = sor.u32 %s47_s23, %s46_s19  ;;  %s937_s21 = sshll.u32 %s322_s26, 3 }
  0x4b   : > { %1879 = sst [smem:[#allocation22_spill]] %s1878_s25  ;;  %p49_p7 = scmp.eq.s32.totalorder %s48_s14, 0 }
  0x4c   : > { %s331_s3 = sadd.s32 %s1435_s10, %s938_s18  ;;  %s326_s4 = scalar_lea.vmem [#allocation2], %s937_s21 }
  0x4d   : > { %s335_s5 = sshll.u32 %s326_s4, 4  ;;  %s939_s27 = sshll.u32 %s331_s3, 7  ;;  %s336_s5 = int_to_ptr.vmem [resolvable:$true] %s335_s5 }
  0x4e   : > { %s1635_s16 = scalar_select %p49_p7, %s1423_s29, %s51_s22  }
  0x4f   : > { %s1881_s0 = sld [smem:[#allocation23_spill]]  ;;  %p1644_p1 = pnand %p1083_p5, %p1622_p10 }
  0x50   : > { %s323_s23 = scalar_lea.sflag [#allocation3], %s322_s26  ;;  %s1268_s18 = scalar_lea.vmem %s336_s5, 128 }
  0x51   : > { %p1257_p9 = pneg %p1644_p1  ;;  %p1269_p12 = scmp.ne.s32.totalorder %s336_s5, %s1268_s18 }
  0x52   : > { %s1450_s3 = smov [#allocation2]  }
  0x53   : > { %p1271_p2 = pnand %p1269_p12, %p1257_p9  ;;  %s1273_s4 = sshll.u32 %s1450_s3, 4  ;;  %s1274_s4 = int_to_ptr.vmem [resolvable:$false] %s1273_s4 }
  0x54   : > { %s1275_s22 = scalar_lea.vmem %s1274_s4, 256  ;;  %p1276_p6 = scmp.lt.s32.totalorder %s336_s5, %s1274_s4 }
  0x55   : > { %s333_s7 = scalar_lea.hbm %s1881_s0, %s939_s27  ;;  %p1272_p4 = pneg %p1271_p2 }
  0x56   : > { %p1277_p11 = scmp.lt.s32.totalorder %s1275_s22, %s1268_s18 }
  0x58   : > { %p1278_p13 = por %p1277_p11, %p1276_p6 }
  0x5a   : > { %p1279_p3 = pnand %p1278_p13, %p1272_p4 }
  0x5c   : > { %1282 = shalt.err (!%p1279_p3)
}
  0x5d   : > { %1069 = dma.hbm_to_vmem [thread:$0]  (!%p1644_p1), %s333_s7, 128, %s336_s5, %s323_s23  }
  0x5e   : > { %344 = sbr.rel (%p1567_p8) target bundleno = 788 (0x314), region = 44  ;;  %s1655_s6 = sand.u32 (!%p1567_p8), 1, %s1419_s28  }
  0x5f   : > { %s1658_s8 = sshll.u32 (!%p1567_p8), %s1655_s6, 3  ;;  %s347_s27 = scalar_lea.sflag (!%p1567_p8), [#allocation3], %s1655_s6 }
  0x60   : > { %s350_s24 = scalar_lea.vmem (!%p1567_p8), [#allocation2], %s1658_s8  ;;  %p1883_p10 = scmp.ne.s32.totalorder (!%p1567_p8), %s1868_s15, 0 }
  0x63   : > { %1394 = dma.done.wait (%p1883_p10), %s347_s27, 128  }
  0x64   : > { %1396 = vsyncadd (%p1883_p10), %s347_s27, 4294967168  ;;  %p1884_p5 = scmp.eq.s32.totalorder %s1546_s13, 0 }
  0x66   : > { %1398 = dma.done.wait (%p1884_p5), [#allocation6], 1024   ;;  %p1885_p8 = pmov %p1884_p5 }
  0x67   : > { %p1886_p7 = pmov %p1884_p5 }
  0x68   : > { %1400 = vsyncadd (%p1885_p8), [#allocation6], 4294966272 }
  0x69   : > { %1402 = dma.done.wait (%p1886_p7), [#allocation9], 512   ;;  %p1887_p1 = pmov %p1884_p5 }
  0x6a   : > { %vm409_vm0 = vcmask 523264   ;;  %v406_v0 = vld [vmem:[%s350_s24] sm:$0xff]  ;;  %v1451_v9 = vmov 0.0   ;;  %vm1452_vm1 = vmmov 0   ;;  %v1167_v12 = vld [vmem:[#allocation5 + $0x8] sm:$0xff]   ;;  %v1169_v14 = vld [vmem:[#allocation5] sm:$0xff]  }
  0x6b   : > { %1404 = vsyncadd (%p1887_p1), [#allocation9], 4294966784  ;;  %v410_v1 = vsel %vm409_vm0, %v406_v0, 0.0  ;;  %v1163_v7 = vld [vmem:[#allocation5 + $0x18] sm:$0xff]   ;;  %1000 = vmatprep.subr.bf16.mxu0 %v1451_v9  ;;  %1012 = vmatprep.subr.bf16.mxu1 %v1451_v9  ;;  %v1165_v10 = vld [vmem:[#allocation5 + $0x10] sm:$0xff]   ;;  %vm515_vm2 = vcmask 257024  }
  0x6c   : > { %411 = vadd.xlane.f32.xlu0 %v410_v1  ;;  %v1164_v8 = vld [vmem:[#allocation7 + $0x18] sm:$0xff]   ;;  %1001 = vmatpush3.bf16.msra.mxu0 %v1163_v7  ;;  %v1166_v11 = vld [vmem:[#allocation7 + $0x10] sm:$0xff]   ;;  %v1168_v13 = vld [vmem:[#allocation7 + $0x8] sm:$0xff]   ;;  %s1453_s25 = smov 96   ;;  %s397_s26 = scalar_lea.vmem [#allocation11], %s1658_s8 }
  0x6d   : > { %1013 = vmatpush3.bf16.msra.mxu1 %v1164_v8  ;;  %1002 = vmatprep.subr.bf16.mxu0 %v1451_v9  ;;  %v1170_v15 = vld [vmem:[#allocation7] sm:$0xff]   ;;  %v948_v20 = vld [vmem:[%s1841_s1] ss:$0 sm:$0xff]  ;;  %v1171_v25 = vld [vmem:[#allocation8 + $0x18] sm:$0xff]   ;;  %s1691_s19 = scalar_lea.vmem [#allocation10], %s1658_s8  ;;  %s1696_s14 = scalar_lea.vmem [#allocation13], %s1658_s8 }
  0x6e   : > { %1014 = vmatprep.subr.bf16.mxu1 %v1451_v9  ;;  %1008 = vmatprep.mubr.msk.bf16.mxu0 %vm1452_vm1, %v1451_v9  ;;  %v949_v22 = vld [vmem:[%s1842_s2] ss:$0 sm:$0xff]  ;;  %v1173_v28 = vld [vmem:[#allocation8 + $0x8] sm:$0xff]   ;;  %v1174_v29 = vld [vmem:[#allocation8] sm:$0xff]   ;;  %s974_s23 = sshll.u32 %s1431_s9, 2  ;;  %s731_s18 = sshll.u32 %s397_s26, 4  ;;  %s1703_s18 = int_to_ptr.vmem [resolvable:$true] %s731_s18 }
  0x6f   : > { %1020 = vmatprep.mubr.msk.bf16.mxu1 %vm1452_vm1, %v1451_v9  ;;  %v1172_v27 = vld [vmem:[#allocation8 + $0x10] sm:$0xff]   ;;  %s711_s3 = sadd.s32 %s1427_s30, %s974_s23  ;;  %s694_s4 = sand.u32 1, %s1546_s13  }
  0x70   : > { %1003 = vmatpush3.bf16.msra.mxu0 %v1165_v10  ;;  %s1705_s22 = sshll.u32 %s711_s3, 6  ;;  %s714_s8 = sshll.u32 %s1691_s19, 4  ;;  %s1715_s8 = int_to_ptr.vmem [resolvable:$true] %s714_s8 }
  0x71   : > { %1015 = vmatpush3.bf16.msra.mxu1 %v1166_v11  ;;  %1004 = vmatprep.subr.bf16.mxu0 %v1451_v9  ;;  %s1889_s5 = sld [smem:[#allocation28_spill]]  ;;  %s1717_s30 = scalar_lea.sflag [#allocation12], %s694_s4 }
  0x72   : > { %1016 = vmatprep.subr.bf16.mxu1 %v1451_v9  ;;  %s1283_s9 = scalar_lea.vmem %s1703_s18, 128  ;;  %s1454_s13 = smov [#allocation11]  }
  0x73   : > { %p1284_p9 = scmp.ne.s32.totalorder %s1703_s18, %s1283_s9  ;;  %s1287_s15 = sshll.u32 %s1454_s13, 4  ;;  %s1288_s15 = int_to_ptr.vmem [resolvable:$false] %s1287_s15 }
  0x74   : > { %1005 = vmatpush3.bf16.msra.mxu0 %v1167_v12  ;;  %s1289_s17 = scalar_lea.vmem %s1288_s15, 256  ;;  %p1290_p4 = scmp.lt.s32.totalorder %s1703_s18, %s1288_s15 }
  0x75   : > { %1017 = vmatpush3.bf16.msra.mxu1 %v1168_v13  ;;  %1006 = vmatprep.subr.bf16.mxu0 %v1451_v9  ;;  %p1285_p12 = pnand %p1284_p9, %p1618_p0  ;;  %p1291_p6 = scmp.lt.s32.totalorder %s1289_s17, %s1283_s9 }
  0x76   : > { %1018 = vmatprep.subr.bf16.mxu1 %v1451_v9 }
  0x77   : > { %s1712_s7 = scalar_lea.hbm %s1889_s5, %s1705_s22  ;;  %p1286_p2 = pneg %p1285_p12 }
  0x78   : > { %1007 = vmatpush3.bf16.msra.mxu0 %v1169_v14  ;;  %p1292_p11 = por %p1291_p6, %p1290_p4 }
  0x79   : > { %1019 = vmatpush3.bf16.msra.mxu1 %v1170_v15  ;;  %1024 = vmatprep.subr.bf16.mxu0 %v1451_v9 }
  0x7a   : > { %p1293_p13 = pnand %p1292_p11, %p1286_p2 }
  0xf5   : > { %v412_v2 = vpop.xlane.xlu0 %411 }
  0xf6   : > { %v414_v3 = vmul.f32 0.015625, %v412_v2 }
  0xf8   : > { %v415_v4 = vsub.f32 %v406_v0, %v414_v3 }
  0xfa   : > { %v416_v5 = vmul.f32 %v415_v4, %v415_v4 }
  0xfc   : > { %v417_v6 = vsel %vm409_vm0, %v416_v5, 0.0 }
  0xfd   : > { %418 = vadd.xlane.f32.xlu0 %v417_v6 }
 0x186   : > { %v419_v16 = vpop.xlane.xlu0 %418 }
 0x187   : > { %v420_v17 = vmul.f32 0.015625, %v419_v16 }
 0x189   : > { %v421_v18 = vadd.f32 1e-05, %v420_v17 }
 0x18b   : > { %1175 = vrsqrt.f32 %v421_v18 }
 0x198   : > { %v1176_v19 = vpop.eup %1175 }
 0x199   : > { %v423_v21 = vmul.f32 %v1176_v19, %v415_v4 }
 0x19b   : > { %v430_v23 = vmul.f32 %v948_v20, %v423_v21 }
 0x19d   : > { %v437_v24 = vadd.f32 %v949_v22, %v430_v23 }
 0x19f   : > { %v438_v26 = vpack.c.bf16 %v437_v24, %v437_v24 }
 0x1a1   : > { %1009 = vmatmul.mubr.msk.bf16.vlgmr.msra.gmra.mxu0 %vm409_vm0, %v438_v26  ;;  %1021 = vmatmul.mubr.msk.bf16.vlgmr.msra.gmra.mxu1 %vm409_vm0, %v438_v26 }
 0x1a2   : > { %1025 = vmatpush3.bf16.msra.mxu0 %v1171_v25  ;;  %1032 = vmatprep.mubr.msk.bf16.mxu0 %vm1452_vm1, %v1451_v9 }
 0x1a3   : > { %1026 = vmatprep.subr.bf16.mxu0 %v1451_v9 }
 0x1a6   : > { %1027 = vmatpush3.bf16.msra.mxu0 %v1172_v27 }
 0x1a7   : > { %1028 = vmatprep.subr.bf16.mxu0 %v1451_v9 }
 0x1aa   : > { %1029 = vmatpush3.bf16.msra.mxu0 %v1173_v28 }
 0x1ab   : > { %1030 = vmatprep.subr.bf16.mxu0 %v1451_v9 }
 0x1ae   : > { %1031 = vmatpush3.bf16.msra.mxu0 %v1174_v29 }
 0x1b1   : > { %1033 = vmatmul.mubr.msk.bf16.vlgmr.msra.gmra.mxu0 %vm409_vm0, %v438_v26 }
 0x261   : > { %v508_v30 = vpop.f32.mrf.mxu0  ;;  %v591_v31 = vpop.f32.mrf.mxu1 }
 0x262   : > { %v514_v32 = vpack.c.bf16 %v508_v30, %v508_v30  ;;  %v597_v33 = vpack.c.bf16 %v591_v31, %v591_v31 }
 0x263   : > { %v1010_v34 = vpop.f32.mrf.mxu0  ;;  %v1022_v35 = vpop.f32.mrf.mxu1 }
 0x264   : > { %602 = vrot.lane.b32.xlu1 %v597_v33, %s1453_s25  ;;  %598 = vst.msk [vmem:[%s397_s26] sm:$0xf] %vm515_vm2, %v597_v33  ;;  %516 = vst.msk [vmem:[%s1691_s19] sm:$0xf] %vm515_vm2, %v514_v32 }
 0x265   : > { %v511_v36 = vpop.f32.mrf.mxu0  ;;  %v594_v37 = vpop.f32.mrf.mxu1 }
 0x267   : > { %v1011_v38 = vpop.f32.mrf.mxu0  ;;  %v1023_v39 = vpop.f32.mrf.mxu1 }
 0x268   : > { %520 = vrot.lane.b32.xlu1 %v514_v32, %s1453_s25 }
 0x271   : > { %v673_v40 = vpop.f32.mrf.mxu0 }
 0x272   : > { %v679_v41 = vpack.c.bf16 %v673_v40, %v673_v40 }
 0x273   : > { %v1034_v42 = vpop.f32.mrf.mxu0 }
 0x274   : > { %684 = vrot.lane.b32.xlu0 %v679_v41, %s1453_s25  ;;  %680 = vst.msk [vmem:[%s1696_s14] sm:$0xf] %vm515_vm2, %v679_v41 }
 0x275   : > { %v676_v43 = vpop.f32.mrf.mxu0 }
 0x277   : > { %v1035_v44 = vpop.f32.mrf.mxu0 }
 0x2d6   : > { %v603_v45 = vpop.permute.xlu1 %602 }
 0x2d7   : > { %963 = vst.msk [vmem:[%s397_s26 + $0x4] sm:$0xf] %vm515_vm2, %v603_v45 }
 0x2d8   : > { %1296 = shalt.err (!%p1293_p13)
}
 0x2d9   : > { %s1297_s25 = scalar_lea.hbm %s1712_s7, 128  ;;  %s1301_s3 = scalar_lea.hbm %s1889_s5, 512 }
 0x2da   : > { %p1298_p3 = scmp.ne.s32.totalorder %s1712_s7, %s1297_s25  ;;  %p1302_p8 = scmp.lt.s32.totalorder %s1712_s7, %s1889_s5 }
 0x2db   : > { %p1303_p7 = scmp.lt.s32.totalorder %s1301_s3, %s1297_s25 }
 0x2dc   : > { %p1299_p10 = pnand %p1298_p3, %p1618_p0 }
 0x2dd   : > { %p1304_p1 = por %p1303_p7, %p1302_p8 }
 0x2de   : > { %p1300_p5 = pneg %p1299_p10 }
 0x2e0   : > { %p1305_p9 = pnand %p1304_p1, %p1300_p5 }
 0x2e2   : > { %1308 = shalt.err (!%p1305_p9)
}
 0x2e3   : > { %s1455_s24 = smov 64   ;;  %s1456_s9 = smov 128   ;;  %v521_v46 = vpop.permute.xlu1 %520 }
 0x2e4   : > { %s1457_s13 = smov 4   ;;  %s1890_s25 = sld [smem:[#allocation27_spill]]  ;;  %956 = vst.msk [vmem:[%s1691_s19 + $0x4] sm:$0xf] %vm515_vm2, %v521_v46 }
 0x2e5   : > { %1051 = dma.vmem_to_hbm [thread:$0]  (%p1618_p0), %s1703_s18, 128, %s1712_s7, %s1717_s30, %s1455_s24, %s1456_s9, %s1457_s13  }
 0x2e6   : > { %s690_s23 = scalar_lea.sflag [#allocation4], %s1655_s6  ;;  %s1309_s3 = scalar_lea.vmem %s1715_s8, 128 }
 0x2e7   : > { %p1310_p12 = scmp.ne.s32.totalorder %s1715_s8, %s1309_s3  ;;  %s1458_s4 = smov [#allocation10]  }
 0x2e8   : > { %s1313_s27 = sshll.u32 %s1458_s4, 4  ;;  %s1314_s27 = int_to_ptr.vmem [resolvable:$false] %s1313_s27 }
 0x2e9   : > { %p1311_p2 = pnand %p1310_p12, %p1618_p0  ;;  %s1315_s0 = scalar_lea.vmem %s1314_s27, 256 }
 0x2ea   : > { %s1747_s26 = scalar_lea.hbm %s1890_s25, %s1705_s22  ;;  %p1316_p6 = scmp.lt.s32.totalorder %s1715_s8, %s1314_s27 }
 0x2eb   : > { %p1312_p4 = pneg %p1311_p2  ;;  %p1317_p11 = scmp.lt.s32.totalorder %s1315_s0, %s1309_s3 }
 0x2ed   : > { %p1318_p13 = por %p1317_p11, %p1316_p6 }
 0x2ef   : > { %p1319_p3 = pnand %p1318_p13, %p1312_p4 }
 0x2f1   : > { %1322 = shalt.err (!%p1319_p3)
}
 0x2f2   : > { %s1323_s19 = scalar_lea.hbm %s1747_s26, 128  ;;  %s1327_s7 = scalar_lea.hbm %s1890_s25, 512 }
 0x2f3   : > { %p1324_p10 = scmp.ne.s32.totalorder %s1747_s26, %s1323_s19  ;;  %p1328_p7 = scmp.lt.s32.totalorder %s1747_s26, %s1890_s25 }
 0x2f4   : > { %p1329_p1 = scmp.lt.s32.totalorder %s1327_s7, %s1323_s19 }
 0x2f5   : > { %p1325_p5 = pnand %p1324_p10, %p1618_p0 }
 0x2f6   : > { %p1330_p9 = por %p1329_p1, %p1328_p7 }
 0x2f7   : > { %p1326_p8 = pneg %p1325_p5 }
 0x2f9   : > { %p1331_p12 = pnand %p1330_p9, %p1326_p8 }
 0x2fb   : > { %1334 = shalt.err (!%p1331_p12)
}
 0x2fc   : > { %1050 = dma.vmem_to_hbm [thread:$0]  (%p1618_p0), %s1715_s8, 128, %s1747_s26, %s690_s23, %s1455_s24, %s1456_s9, %s1457_s13   ;;  %v685_v47 = vpop.permute.xlu0 %684 }
 0x2fd   : > { %s748_s0 = sshll.u32 %s1696_s14, 4  ;;  %s1891_s27 = sld [smem:[#allocation29_spill]]  ;;  %970 = vst.msk [vmem:[%s1696_s14 + $0x4] sm:$0xf] %vm515_vm2, %v685_v47  ;;  %s1776_s0 = int_to_ptr.vmem [resolvable:$true] %s748_s0 }
 0x2fe   : > { %s1335_s18 = scalar_lea.vmem %s1776_s0, 128  ;;  %s1459_s8 = smov [#allocation13]  }
 0x2ff   : > { %p1336_p2 = scmp.ne.s32.totalorder %s1776_s0, %s1335_s18  ;;  %s1339_s26 = sshll.u32 %s1459_s8, 4  ;;  %s1340_s26 = int_to_ptr.vmem [resolvable:$false] %s1339_s26 }
 0x300   : > { %s1341_s23 = scalar_lea.vmem %s1340_s26, 256  ;;  %p1342_p11 = scmp.lt.s32.totalorder %s1776_s0, %s1340_s26 }
 0x301   : > { %p1337_p4 = pnand %p1336_p2, %p1618_p0  ;;  %p1343_p13 = scmp.lt.s32.totalorder %s1341_s23, %s1335_s18 }
 0x303   : > { %s1892_s19 = smov %s1891_s27  ;;  %s1782_s6 = scalar_lea.hbm %s1891_s27, %s1705_s22 }
 0x304   : > { %p1338_p6 = pneg %p1337_p4  ;;  %p1344_p3 = por %p1343_p13, %p1342_p11 }
 0x306   : > { %p1345_p10 = pnand %p1344_p3, %p1338_p6 }
 0x308   : > { %1348 = shalt.err (!%p1345_p10)
}
 0x309   : > { %s1349_s22 = scalar_lea.hbm %s1782_s6, 128  ;;  %s1353_s15 = scalar_lea.hbm %s1892_s19, 512 }
 0x30a   : > { %p1350_p5 = scmp.ne.s32.totalorder %s1782_s6, %s1349_s22  ;;  %p1354_p1 = scmp.lt.s32.totalorder %s1782_s6, %s1892_s19 }
 0x30b   : > { %p1355_p9 = scmp.lt.s32.totalorder %s1353_s15, %s1349_s22 }
 0x30c   : > { %p1351_p8 = pnand %p1350_p5, %p1618_p0 }
 0x30d   : > { %p1356_p12 = por %p1355_p9, %p1354_p1 }
 0x30e   : > { %p1352_p7 = pneg %p1351_p8 }
 0x310   : > { %p1357_p2 = pnand %p1356_p12, %p1352_p7 }
 0x312   : > { %1360 = shalt.err (!%p1357_p2)
}
 0x313   : > { %1052 = dma.vmem_to_hbm [thread:$0]  (%p1618_p0), %s1776_s0, 128, %s1782_s6, %s1717_s30, %s1455_s24, %s1456_s9, %s1457_s13  }
 0x314 PF: > { %s1893_s4 = sld [smem:[#allocation19_spill]]  ;;  %p1087_p4 = scmp.ge.s32.totalorder %s1443_s12, 2 }
 0x315   : > { %s1894_s27 = sld [smem:[#allocation20_spill]] }
 0x31a   : > { %s763_s18 = sand.u32 1, %s1893_s4  }
 0x31b   : > { %p1895_p6 = scmp.ne.s32.totalorder %s1894_s27, 0  ;;  %s764_s8 = scalar_lea.sflag [#allocation4], %s763_s18 }
 0x31d   : > { %p1071_p11 = pnand %p1087_p4, %p1895_p6 }
 0x31f   : > { %p1072_p13 = pneg %p1071_p11 }
 0x321   : > { %1406 = dma.done.wait (%p1072_p13), %s764_s8, 128  }
 0x322   : > { %1408 = vsyncadd (%p1072_p13), %s764_s8, 4294967168  ;;  %s1896_s21 = sadd.s32 4294967294, %s1443_s12  }
 0x323   : > { %s772_s26 = sand.u32 1, %s1896_s21  }
 0x324   : > { %s773_s23 = scalar_lea.sflag [#allocation12], %s772_s26 }
 0x325   : > { %1410 = dma.done.wait (%p1072_p13), %s773_s23, 256  }
 0x326   : > { %1412 = vsyncadd (%p1072_p13), %s773_s23, 4294967040  ;;  %s30_s12 = sadd.s32 1, %s1443_s12   ;;  %s1897_s24 = sld [smem:[#allocation21_spill]] }
 0x327   : > { %p27_p0 = scmp.ge.s32.totalorder %s30_s12, 6   ;;  %s1898_s27 = smov %s1419_s28 }
 0x328   : > { %s1899_s28 = smov %s1423_s29  ;;  %s1900_s29 = smov %s1635_s16 }
 0x329   : > { %s1901_s30 = smov %s1435_s10  ;;  %s1902_s9 = smov %s1439_s11 }
 0x32a   : > { %s1904_s11 = smov %s1910_s20  ;;  %29 = sbr.rel (!%p27_p0) target bundleno = 19 (0x13), region = 136 }
 0x32c   : > { %s1903_s10 = smov %s1897_s24 }
 0x32f   :  { %787 = vsyncpa [#allocation3], 1 }
 0x330   :  { %789 = vsyncpa [#allocation3 + $0x1], 1 }
 0x331   :  { %790 = vsyncpa [#allocation6], 1 }
 0x332   :  { %791 = vsyncpa [#allocation9], 1 }
 0x333   :  { %792 = vsyncpa [#allocation4], 1 }
 0x334   :  { %794 = vsyncpa [#allocation4 + $0x1], 1 }
 0x335   :  { %795 = vsyncpa [#allocation12], 1 }
 0x336   :  { %797 = vsyncpa [#allocation12 + $0x1], 1 }

</bundles_post_ra>
